<compile_context>
chip_gen: v7x
topology: tpu7x:2x2x1
jax: 0.10.0
libtpu: 0.0.40
codegen_flags: <defaults>
</compile_context>

<pallas_src>
import math

import numpy as np
import jax
import jax.numpy as jnp
from jax.experimental import pallas as pl
from jax.experimental.pallas import tpu as pltpu


# Sized for v7x (64 MiB physical VMEM, ~32 MiB default scoped); v5e/v6e have 128 MiB
# physical so the same budget is safely conservative there, and at bm<=4096 the
# ~0.35us/step pipeline overhead is already <2% of the per-step DMA time.
_VMEM_BUDGET = 40 * 1024 * 1024   # what we size blocks against
_VMEM_LIMIT = 48 * 1024 * 1024    # explicit scoped-VMEM limit handed to Mosaic
_BM_CAP = 4096                    # rows per grid step (review target 2048-4096)


def _mat_dtype(dtype):
    if dtype in (jnp.bfloat16, jnp.float32):
        return dtype              # exact 0/1 copy in the native dtype on the MXU
    # TODO(synk): integer inputs with |x| > 2^24 lose exactness through the f32
    # copy-matmul; an int-accumulating MXU path (v5e/v6e) or a VPU interleave copy
    # would make this exact on all generations.
    return jnp.float32


def _sublane(dtype):
    # packed-sublane granularity: 8 for f32, 16 for bf16, 32 for int8
    return max(8, 32 // np.dtype(dtype).itemsize)


def _pick_bm(n_rows, per_row_bytes, const_bytes, sub):
    """Rows per grid step: as large as the VMEM budget allows, sublane-aligned."""
    avail = _VMEM_BUDGET - const_bytes
    bm = max(sub, min(avail // per_row_bytes, _BM_CAP))
    bm = (int(bm) // sub) * sub
    if n_rows <= bm:
        return int(n_rows)        # single block == full dim (always a legal block)
    return bm


# --------------------- fold path (H == W, W < 128, e.g. the test) ---------------------
# Fold k = 128/gcd(W,128) input rows per matrix row so the input width k*W is an exact
# multiple of 128 and the output width 4*k*W is lane-dense.  One matmul against a
# constant 0/1 selection matrix does row dup + column dup + layout in one shot.

def _up2x_rows_kernel(x_ref, a_ref, o_ref):
    # x_ref: (bm, k*W)   folded input rows
    # a_ref: (k*W, 4*k*W) constant 0/1 selection matrix (one 1 per column -> exact copy)
    # o_ref: (bm, 4*k*W) folded output rows (lane-dense, unmasked stores)
    x = x_ref[...].astype(a_ref.dtype)
    # f32 accumulation kept for lowering safety; the copy is exact either way (one
    # nonzero per A column).  For f32 inputs this is already the native dtype.
    y = jnp.dot(x, a_ref[...], preferred_element_type=jnp.float32)
    o_ref[...] = y.astype(o_ref.dtype)


def _up2x_fold(x, k):
    N, C, H, W = x.shape
    S = 2 * W
    M = N * C * H
    kw = k * W                    # = lcm(W, 128): exact multiple of 128
    ko = 4 * kw

    x2 = x.reshape(M, W)
    M_pad = -(-M // k) * k
    if M_pad != M:                # pad rows so k | M; result sliced back below
        x2 = jnp.pad(x2, ((0, M_pad - M), (0, 0)))
    mk = M_pad // k
    x2 = x2.reshape(mk, kw)       # contiguous reshape: free

    mat_dtype = _mat_dtype(x.dtype)
    e = np.arange(ko)
    src = (e // (4 * W)) * W + (e % (2 * W)) // 2
    a = np.zeros((kw, ko), dtype=np.dtype(mat_dtype))
    a[src, e] = 1
    a = jnp.asarray(a)

    itemsize = np.dtype(x.dtype).itemsize
    a_bytes = 2 * kw * ko * np.dtype(mat_dtype).itemsize      # A double-buffered
    per_row = 2 * (kw + ko) * itemsize                        # in+out, double-buffered
    bm = _pick_bm(mk, per_row, a_bytes, _sublane(x.dtype))
    grid = (pl.cdiv(mk, bm),)

    out2 = pl.pallas_call(
        _up2x_rows_kernel,
        out_shape=jax.ShapeDtypeStruct((mk, ko), x.dtype),
        grid_spec=pltpu.PrefetchScalarGridSpec(
            num_scalar_prefetch=0,
            grid=grid,
            in_specs=[
                pl.BlockSpec((bm, kw), lambda i: (i, 0)),
                pl.BlockSpec((kw, ko), lambda i: (0, 0)),   # constant block, stays resident
            ],
            out_specs=pl.BlockSpec((bm, ko), lambda i: (i, 0)),
        ),
        compiler_params=pltpu.CompilerParams(
            dimension_semantics=("parallel",),              # megacore split on v7x
            vmem_limit_bytes=_VMEM_LIMIT),
        cost_estimate=pl.CostEstimate(
            flops=2 * mk * kw * ko,
            transcendentals=0,
            bytes_accessed=(mk * kw + mk * ko) * itemsize
                           + kw * ko * np.dtype(mat_dtype).itemsize),
    )(x2, a)

    out = out2.reshape(M_pad, 2, S)
    if M_pad != M:
        out = out[:M]
    return out.reshape(N, C, S, S)                          # contiguous reshape: free


# ----------------------- W-tiled dual-store path (H == W, W >= 128) -----------------------
# A is a fixed (Wt, 2*Wt) column-duplication matrix (Wt=128) regardless of W, and the row
# duplication is two stores of the same matmul result into the (bm, 2, 2*Wt) output block
# (the output array is viewed as (M, 2, 2W), a contiguous reinterpretation of NCHW out).

def _up2x_dual_kernel(x_ref, a_ref, o_ref):
    # x_ref: (bm, Wt), a_ref: (Wt, 2*Wt), o_ref: (bm, 2, 2*Wt)
    y = jnp.dot(x_ref[...].astype(a_ref.dtype), a_ref[...],
                preferred_element_type=jnp.float32).astype(o_ref.dtype)
    o_ref[:, 0, :] = y            # output row 2i
    o_ref[:, 1, :] = y            # output row 2i+1 (nearest-neighbour row dup)


def _up2x_dual(x):
    N, C, H, W = x.shape
    S = 2 * W
    M = N * C * H
    Wt = 128 if W >= 128 else W   # W<128 only reaches here for awkward widths (masked lanes, still correct)

    mat_dtype = _mat_dtype(x.dtype)
    cols = np.arange(2 * Wt)
    a = np.zeros((Wt, 2 * Wt), dtype=np.dtype(mat_dtype))
    a[cols // 2, cols] = 1
    a = jnp.asarray(a)

    x2 = x.reshape(M, W)
    itemsize = np.dtype(x.dtype).itemsize
    a_bytes = 2 * Wt * 2 * Wt * np.dtype(mat_dtype).itemsize
    # out block (bm, 2, 2*Wt): budget its VMEM pessimistically at 8 sublanes (layout padding).
    per_row = (2 * Wt + 2 * 8 * 2 * Wt) * itemsize
    bm = _pick_bm(M, per_row, a_bytes, _sublane(x.dtype))
    n_col = -(-W // Wt)
    grid = (pl.cdiv(M, bm), n_col)

    out3 = pl.pallas_call(
        _up2x_dual_kernel,
        out_shape=jax.ShapeDtypeStruct((M, 2, S), x.dtype),
        grid_spec=pltpu.PrefetchScalarGridSpec(
            num_scalar_prefetch=0,
            grid=grid,
            in_specs=[
                pl.BlockSpec((bm, Wt), lambda i, j: (i, j)),
                pl.BlockSpec((Wt, 2 * Wt), lambda i, j: (0, 0)),   # constant, resident
            ],
            out_specs=pl.BlockSpec((bm, 2, 2 * Wt), lambda i, j: (i, 0, j)),
        ),
        compiler_params=pltpu.CompilerParams(
            dimension_semantics=("parallel", "parallel"),
            vmem_limit_bytes=_VMEM_LIMIT),
        cost_estimate=pl.CostEstimate(
            flops=2 * M * (n_col * Wt) * (2 * Wt),
            transcendentals=0,
            bytes_accessed=(M * W + M * 2 * S) * itemsize
                           + Wt * 2 * Wt * np.dtype(mat_dtype).itemsize),
    )(x2, a)

    return out3.reshape(N, C, S, S)                          # contiguous reshape: free


# ---------------------------- general fallback (H != W) ----------------------------
# The module always emits (2W, 2W); when H != W the row mapping is floor(r*H/(2W)),
# so use the per-plane Rh @ x @ Rw formulation.  Rarely hit; low priority per review.

def _up2x_plane_kernel(x_ref, rh_ref, rw_ref, o_ref):
    # x_ref: (1, H, W), rh_ref: (S, H), rw_ref: (W, S), o_ref: (1, S, S)
    x = x_ref[0].astype(jnp.float32)
    t = jnp.dot(rh_ref[...], x, preferred_element_type=jnp.float32)     # (S, W)
    y = jnp.dot(t, rw_ref[...], preferred_element_type=jnp.float32)     # (S, S)
    o_ref[0] = y.astype(o_ref.dtype)


def _up2x_general(x):
    N, C, H, W = x.shape
    S = 2 * W                                  # module uses s = x.size(-1) * 2 for BOTH dims
    oh = np.arange(S)
    rh = np.zeros((S, H), np.float32)
    rh[oh, (oh * H) // S] = 1.0
    ow = np.arange(S)
    rw = np.zeros((W, S), np.float32)
    rw[(ow * W) // S, ow] = 1.0
    rh = jnp.asarray(rh)
    rw = jnp.asarray(rw)

    x_flat = x.reshape(N * C, H, W)
    out = pl.pallas_call(
        _up2x_plane_kernel,
        out_shape=jax.ShapeDtypeStruct((N * C, S, S), x.dtype),
        grid_spec=pltpu.PrefetchScalarGridSpec(
            num_scalar_prefetch=0,
            grid=(N * C,),
            in_specs=[
                pl.BlockSpec((1, H, W), lambda i: (i, 0, 0)),
                pl.BlockSpec((S, H), lambda i: (0, 0)),
                pl.BlockSpec((W, S), lambda i: (0, 0)),
            ],
            out_specs=pl.BlockSpec((1, S, S), lambda i: (i, 0, 0)),
        ),
        compiler_params=pltpu.CompilerParams(
            dimension_semantics=("parallel",)),
    )(x_flat, rh, rw)
    return out.reshape(N, C, S, S)


# --------------------------------------- dispatch ---------------------------------------

def up2x(x):
    """Nearest-neighbor upsample of an NCHW tensor to spatial size (2*W, 2*W)."""
    N, C, H, W = x.shape
    if H != W:
        return _up2x_general(x)
    k = 128 // math.gcd(W, 128)               # fold so k*W = lcm(W, 128) (multiple of 128)
    if W < 128 and k * W <= 768:              # keep A and the contraction depth bounded
        return _up2x_fold(x, k)
    return _up2x_dual(x)                      # W-tiled, A and MXU work independent of W


if __name__ == "__main__":
    key = jax.random.PRNGKey(0)
    N, C, H, W = 2, 4, 16, 16
    x = jax.random.normal(key, (N, C, H, W), dtype=jnp.float32)

    y = up2x(x)
    y = jax.block_until_ready(y)

    # Reference (pure JAX) nearest 2x upsample for H == W.
    ref = jnp.repeat(jnp.repeat(x, 2, axis=2), 2, axis=3)

    assert y.shape == (N, C, 2 * W, 2 * W), y.shape
    assert y.dtype == x.dtype
    np.testing.assert_allclose(np.asarray(y), np.asarray(ref), rtol=0, atol=0)

    print("KERNEL_OK")
</pallas_src>

<mosaic_0001>
module attributes {stable_mosaic.version = 11 : i64} {
  func.func @_up2x_rows_kernel(%arg0: i32, %arg1: memref<16x128xf32, #tpu.memory_space<vmem>>, %arg2: memref<128x512xf32, #tpu.memory_space<vmem>>, %arg3: memref<16x512xf32, #tpu.memory_space<vmem>>) attributes {dimension_semantics = [#tpu.dimension_semantics<parallel>], iteration_bounds = array<i64: 1>, scalar_prefetch = 0 : i64, scratch_operands = 0 : i64, tpu.core_type = #tpu.core_type<tc>, window_params = [{transform_indices = @transform_0, window_bounds = array<i64: 16, 128>}, {pipeline_mode = #tpu.pipeline_mode<synchronous>, transform_indices = @transform_1, window_bounds = array<i64: 128, 512>}, {transform_indices = @transform_2, window_bounds = array<i64: 16, 512>}]} {
    %c0 = arith.constant 0 : index
    %c0_0 = arith.constant 0 : index
    %0 = vector.load %arg1[%c0, %c0_0] : memref<16x128xf32, #tpu.memory_space<vmem>>, vector<16x128xf32>
    %c0_1 = arith.constant 0 : index
    %c0_2 = arith.constant 0 : index
    %1 = vector.load %arg2[%c0_1, %c0_2] : memref<128x512xf32, #tpu.memory_space<vmem>>, vector<128x512xf32>
    %cst = arith.constant dense<0.000000e+00> : vector<16x512xf32>
    %2 = tpu.matmul %0, %1, %cst {dimension_numbers = #tpu.dot_dimension_numbers<[1], [0], [0], [1], [0, 0, 1, 1], [], []>} : vector<16x128xf32>, vector<128x512xf32>, vector<16x512xf32> -> vector<16x512xf32>
    %c0_3 = arith.constant 0 : index
    %c0_4 = arith.constant 0 : index
    %3 = vector.load %arg3[%c0_3, %c0_4] : memref<16x512xf32, #tpu.memory_space<vmem>>, vector<16x512xf32>
    tpu.vector_store %arg3[%c0_3, %c0_4], %2 {strides = array<i32>} : memref<16x512xf32, #tpu.memory_space<vmem>>, vector<16x512xf32>,
    return
  }
  func.func @transform_0(%arg0: i32) -> (i32, i32) {
    %c0_i32 = arith.constant 0 : i32
    %c0_i32_0 = arith.constant 0 : i32
    return %arg0, %c0_i32 : i32, i32
  }
  func.func @transform_1(%arg0: i32) -> (i32, i32) {
    %c0_i32 = arith.constant 0 : i32
    %c0_i32_0 = arith.constant 0 : i32
    %c0_i32_1 = arith.constant 0 : i32
    return %c0_i32, %c0_i32_0 : i32, i32
  }
  func.func @transform_2(%arg0: i32) -> (i32, i32) {
    %c0_i32 = arith.constant 0 : i32
    %c0_i32_0 = arith.constant 0 : i32
    return %arg0, %c0_i32 : i32, i32
  }
}

</mosaic_0001>

<bundles_post_ra>
// kernel: tpu_custom_call.1
= control target key start
LH: loop header
LB: loop body
LE: loop exit
PB: predicated region body
PF: predicated region fallthrough
CT: control target
= control target key end

     0   :  { %7 = vsyncpa [#allocation3], 0  ;;  %s499_s0 = inlined_call_operand.hbm [shape: f32[16,128], index: 0, kind: input, shape index: {}]   ;;  %s500_s1 = inlined_call_operand.hbm [shape: f32[128,512], index: 1, kind: input, shape index: {}]   ;;  %s501_s2 = inlined_call_operand.hbm [shape: f32[16,512], index: 2, kind: output, shape index: {}]  }
   0x1   :  { %8 = vsyncpa [#allocation6], 0 }
   0x2   :  { %9 = vsyncpa [#allocation4], 0  ;;  %s430_s9 = smov [#allocation2]   ;;  %s358_s13 = scalar_lea.hbm %s499_s0, 256 }
   0x3   :  { %s15_s10 = sshll.u32 %s430_s9, 4  ;;  %p359_p0 = scmp.ne.s32.totalorder %s499_s0, %s358_s13  ;;  %s16_s10 = int_to_ptr.vmem [resolvable:$true] %s15_s10 }
   0x4   :  { %p362_p1 = scmp.lt.u32.totalorder %s358_s13, %s499_s0 }
   0x6   :  { %p364_p2 = pnand %p362_p1, %p359_p0 }
   0x8   :  { %367 = shalt.err (!%p364_p2)
}
   0x9   :  { %s368_s18 = scalar_lea.vmem %s16_s10, 256  ;;  %p373_p4 = scmp.lt.s32.totalorder %s16_s10, %s16_s10 }
   0xa   :  { %p369_p3 = scmp.ne.s32.totalorder %s16_s10, %s368_s18  ;;  %p374_p5 = scmp.lt.s32.totalorder %s368_s18, %s368_s18 }
   0xc   :  { %p375_p6 = por %p374_p5, %p373_p4 }
   0xe   :  { %p376_p7 = pnand %p375_p6, %p369_p3 }
  0x10   :  { %379 = shalt.err (!%p376_p7)
}
  0x11   :  { %s431_s19 = smov 128   ;;  %s432_s20 = smov 8  }
  0x12   :  { %21 = dma.hbm_to_vmem [thread:$0]  %s499_s0, 256, %s16_s10, [#allocation3], %s431_s19, %s431_s19, %s432_s20  }
  0x13   :  { %s433_s23 = smov [#allocation5]   ;;  %s380_s27 = scalar_lea.hbm %s500_s1, 8192 }
  0x14   :  { %s27_s24 = sshll.u32 %s433_s23, 4  ;;  %p381_p8 = scmp.ne.s32.totalorder %s500_s1, %s380_s27  ;;  %s28_s24 = int_to_ptr.vmem [resolvable:$true] %s27_s24 }
  0x15   :  { %p384_p9 = scmp.lt.u32.totalorder %s380_s27, %s500_s1 }
  0x17   :  { %p386_p10 = pnand %p384_p9, %p381_p8 }
  0x19   :  { %389 = shalt.err (!%p386_p10)
}
  0x1a   :  { %s390_s4 = scalar_lea.vmem %s28_s24, 8192  ;;  %p395_p12 = scmp.lt.s32.totalorder %s28_s24, %s28_s24 }
  0x1b   :  { %p391_p11 = scmp.ne.s32.totalorder %s28_s24, %s390_s4  ;;  %p396_p13 = scmp.lt.s32.totalorder %s390_s4, %s390_s4 }
  0x1d   :  { %p397_p0 = por %p396_p13, %p395_p12 }
  0x1f   :  { %p398_p1 = pnand %p397_p0, %p391_p11 }
  0x21   :  { %401 = shalt.err (!%p398_p1)
}
  0x22   :  { %s434_s0 = smov 512   ;;  %s435_s5 = smov 32  }
  0x23   :  { %33 = dma.hbm_to_vmem [thread:$0]  %s500_s1, 8192, %s28_s24, [#allocation6], %s434_s0, %s434_s0, %s435_s5  }
  0x24   :  { %424 = dma.done.wait [#allocation3], 256  }
  0x25   :  { %425 = vsyncadd [#allocation3], 4294967040 }
  0x26   :  { %426 = dma.done.wait [#allocation6], 8192  }
  0x27   :  { %427 = vsyncadd [#allocation6], 4294959104  ;;  %v436_v0 = vmov 0.0   ;;  %v43_v1 = vld [vmem:[#allocation5 + $0x8] sm:$0xff]  ;;  %v45_v3 = vld [vmem:[#allocation5 + $0x18] sm:$0xff]  ;;  %s437_s1 = smov [#allocation7]  }
  0x28   :  { %170 = vmatprep.mubr.f32.mxu0 %v436_v0  ;;  %247 = vmatprep.mubr.f32.mxu1 %v436_v0  ;;  %v47_v2 = vld [vmem:[#allocation5 + $0x28] sm:$0xff]  ;;  %v49_v5 = vld [vmem:[#allocation5 + $0x38] sm:$0xff]  ;;  %v42_v6 = vld [vmem:[#allocation5] sm:$0xff]  ;;  %s273_s8 = sshll.u32 %s437_s1, 4  ;;  %s274_s8 = int_to_ptr.vmem [resolvable:$true] %s273_s8 }
  0x29   :  { %v286_v4 = vpack.c.bf16 %v47_v2, %v43_v1  ;;  %v46_v7 = vld [vmem:[#allocation5 + $0x20] sm:$0xff]  ;;  %v318_v8 = vpack.c.bf16 %v49_v5, %v45_v3  ;;  %v44_v10 = vld [vmem:[#allocation5 + $0x10] sm:$0xff]  ;;  %v51_v12 = vld [vmem:[#allocation5 + $0x48] sm:$0xff]  ;;  %s402_s9 = scalar_lea.vmem %s274_s8, 1024  ;;  %p407_p3 = scmp.lt.s32.totalorder %s274_s8, %s274_s8 }
  0x2a   :  { %v288_v9 = vpack.c.bf16 %v46_v7, %v42_v6  ;;  %v48_v11 = vld [vmem:[#allocation5 + $0x30] sm:$0xff]  ;;  %v55_v14 = vld [vmem:[#allocation5 + $0x68] sm:$0xff]  ;;  %v53_v15 = vld [vmem:[#allocation5 + $0x58] sm:$0xff]  ;;  %p403_p2 = scmp.ne.s32.totalorder %s274_s8, %s402_s9  ;;  %p408_p4 = scmp.lt.s32.totalorder %s402_s9, %s402_s9 }
  0x2b   :  { %287 = vmatprep.subr.bf16.mxu0 %v286_v4  ;;  %v320_v13 = vpack.c.bf16 %v48_v11, %v44_v10  ;;  %v57_v16 = vld [vmem:[#allocation5 + $0x78] sm:$0xff]  ;;  %319 = vmatprep.subr.bf16.mxu1 %v318_v8  ;;  %v290_v17 = vpack.c.bf16 %v55_v14, %v51_v12  ;;  %v50_v19 = vld [vmem:[#allocation5 + $0x40] sm:$0xff]  ;;  %v52_v21 = vld [vmem:[#allocation5 + $0x50] sm:$0xff] }
  0x2c   :  { %289 = vmatpush1.bf16.msra.mxu0 %v288_v9  ;;  %v322_v18 = vpack.c.bf16 %v57_v16, %v53_v15  ;;  %v54_v20 = vld [vmem:[#allocation5 + $0x60] sm:$0xff]  ;;  %v56_v23 = vld [vmem:[#allocation5 + $0x70] sm:$0xff]  ;;  %v59_v24 = vld [vmem:[#allocation5 + $0x88] sm:$0xff]  ;;  %p409_p5 = por %p408_p4, %p407_p3 }
  0x2d   :  { %321 = vmatpush1.bf16.msra.mxu1 %v320_v13  ;;  %v292_v22 = vpack.c.bf16 %v54_v20, %v50_v19  ;;  %v63_v25 = vld [vmem:[#allocation5 + $0xa8] sm:$0xff]  ;;  %291 = vmatprep.subr.bf16.mxu0 %v290_v17  ;;  %v324_v26 = vpack.c.bf16 %v56_v23, %v52_v21  ;;  %v61_v28 = vld [vmem:[#allocation5 + $0x98] sm:$0xff]  ;;  %v58_v30 = vld [vmem:[#allocation5 + $0x80] sm:$0xff] }
  0x2e   :  { %323 = vmatprep.subr.bf16.mxu1 %v322_v18  ;;  %v294_v27 = vpack.c.bf16 %v63_v25, %v59_v24  ;;  %v65_v29 = vld [vmem:[#allocation5 + $0xb8] sm:$0xff]  ;;  %v62_v32 = vld [vmem:[#allocation5 + $0xa0] sm:$0xff]  ;;  %v60_v33 = vld [vmem:[#allocation5 + $0x90] sm:$0xff]  ;;  %p410_p6 = pnand %p409_p5, %p403_p2 }
  0x2f   :  { %v326_v31 = vpack.c.bf16 %v65_v29, %v61_v28  ;;  %v64_v34 = vld [vmem:[#allocation5 + $0xb0] sm:$0xff]  ;;  %v296_v35 = vpack.c.bf16 %v62_v32, %v58_v30  ;;  %v67_v36 = vld [vmem:[#allocation5 + $0xc8] sm:$0xff]  ;;  %v69_v38 = vld [vmem:[#allocation5 + $0xd8] sm:$0xff] }
  0x30   :  { %293 = vmatpush1.bf16.msra.mxu0 %v292_v22  ;;  %v71_v37 = vld [vmem:[#allocation5 + $0xe8] sm:$0xff]  ;;  %v328_v39 = vpack.c.bf16 %v64_v34, %v60_v33  ;;  %v73_v41 = vld [vmem:[#allocation5 + $0xf8] sm:$0xff]  ;;  %v66_v42 = vld [vmem:[#allocation5 + $0xc0] sm:$0xff] }
  0x31   :  { %325 = vmatpush1.bf16.msra.mxu1 %v324_v26  ;;  %295 = vmatprep.subr.bf16.mxu0 %v294_v27  ;;  %v298_v40 = vpack.c.bf16 %v71_v37, %v67_v36  ;;  %v70_v43 = vld [vmem:[#allocation5 + $0xe0] sm:$0xff]  ;;  %v330_v44 = vpack.c.bf16 %v73_v41, %v69_v38  ;;  %v68_v45 = vld [vmem:[#allocation5 + $0xd0] sm:$0xff]  ;;  %v75_v47 = vld [vmem:[#allocation5 + $0x108] sm:$0xff] }
  0x32   :  { %327 = vmatprep.subr.bf16.mxu1 %v326_v31  ;;  %v72_v46 = vld [vmem:[#allocation5 + $0xf0] sm:$0xff]  ;;  %v79_v48 = vld [vmem:[#allocation5 + $0x128] sm:$0xff]  ;;  %v77_v49 = vld [vmem:[#allocation5 + $0x118] sm:$0xff]  ;;  %v300_v51 = vpack.c.bf16 %v70_v43, %v66_v42 }
  0x33   :  { %v81_v50 = vld [vmem:[#allocation5 + $0x138] sm:$0xff]  ;;  %v332_v52 = vpack.c.bf16 %v72_v46, %v68_v45  ;;  %v302_v53 = vpack.c.bf16 %v79_v48, %v75_v47  ;;  %v74_v54 = vld [vmem:[#allocation5 + $0x100] sm:$0xff]  ;;  %v76_v56 = vld [vmem:[#allocation5 + $0x110] sm:$0xff] }
  0x34   :  { %297 = vmatpush1.bf16.msra.mxu0 %v296_v35  ;;  %v78_v55 = vld [vmem:[#allocation5 + $0x120] sm:$0xff]  ;;  %v334_v57 = vpack.c.bf16 %v81_v50, %v77_v49  ;;  %v80_v58 = vld [vmem:[#allocation5 + $0x130] sm:$0xff]  ;;  %v83_v59 = vld [vmem:[#allocation5 + $0x148] sm:$0xff] }
  0x35   :  { %329 = vmatpush1.bf16.msra.mxu1 %v328_v39  ;;  %299 = vmatprep.subr.bf16.mxu0 %v298_v40  ;;  %v87_v60 = vld [vmem:[#allocation5 + $0x168] sm:$0xff]  ;;  %v85_v61 = vld [vmem:[#allocation5 + $0x158] sm:$0xff]  ;;  %v304_v63 = vpack.c.bf16 %v78_v55, %v74_v54  ;;  %v336_v1 = vpack.c.bf16 %v80_v58, %v76_v56  ;;  %v82_v3 = vld [vmem:[#allocation5 + $0x140] sm:$0xff] }
  0x36   :  { %331 = vmatprep.subr.bf16.mxu1 %v330_v44  ;;  %v89_v62 = vld [vmem:[#allocation5 + $0x178] sm:$0xff]  ;;  %v306_v2 = vpack.c.bf16 %v87_v60, %v83_v59  ;;  %v86_v4 = vld [vmem:[#allocation5 + $0x160] sm:$0xff]  ;;  %v84_v5 = vld [vmem:[#allocation5 + $0x150] sm:$0xff] }
  0x37   :  { %v338_v6 = vpack.c.bf16 %v89_v62, %v85_v61  ;;  %v88_v7 = vld [vmem:[#allocation5 + $0x170] sm:$0xff]  ;;  %v91_v8 = vld [vmem:[#allocation5 + $0x188] sm:$0xff]  ;;  %v93_v10 = vld [vmem:[#allocation5 + $0x198] sm:$0xff]  ;;  %v308_v12 = vpack.c.bf16 %v86_v4, %v82_v3 }
  0x38   :  { %301 = vmatpush1.bf16.msra.mxu0 %v300_v51  ;;  %v95_v9 = vld [vmem:[#allocation5 + $0x1a8] sm:$0xff]  ;;  %v97_v11 = vld [vmem:[#allocation5 + $0x1b8] sm:$0xff]  ;;  %v340_v13 = vpack.c.bf16 %v88_v7, %v84_v5  ;;  %v90_v15 = vld [vmem:[#allocation5 + $0x180] sm:$0xff] }
  0x39   :  { %333 = vmatpush1.bf16.msra.mxu1 %v332_v52  ;;  %303 = vmatprep.subr.bf16.mxu0 %v302_v53  ;;  %v310_v14 = vpack.c.bf16 %v95_v9, %v91_v8  ;;  %v94_v16 = vld [vmem:[#allocation5 + $0x1a0] sm:$0xff]  ;;  %v92_v17 = vld [vmem:[#allocation5 + $0x190] sm:$0xff]  ;;  %v342_v18 = vpack.c.bf16 %v97_v11, %v93_v10  ;;  %v99_v20 = vld [vmem:[#allocation5 + $0x1c8] sm:$0xff] }
  0x3a   :  { %335 = vmatprep.subr.bf16.mxu1 %v334_v57  ;;  %v96_v19 = vld [vmem:[#allocation5 + $0x1b0] sm:$0xff]  ;;  %v103_v21 = vld [vmem:[#allocation5 + $0x1e8] sm:$0xff]  ;;  %v101_v22 = vld [vmem:[#allocation5 + $0x1d8] sm:$0xff]  ;;  %v312_v24 = vpack.c.bf16 %v94_v16, %v90_v15 }
  0x3b   :  { %v105_v23 = vld [vmem:[#allocation5 + $0x1f8] sm:$0xff]  ;;  %v344_v25 = vpack.c.bf16 %v96_v19, %v92_v17  ;;  %v314_v26 = vpack.c.bf16 %v103_v21, %v99_v20  ;;  %v98_v27 = vld [vmem:[#allocation5 + $0x1c0] sm:$0xff]  ;;  %v100_v30 = vld [vmem:[#allocation5 + $0x1d0] sm:$0xff] }
  0x3c   :  { %305 = vmatpush1.bf16.msra.mxu0 %v304_v63  ;;  %v102_v28 = vld [vmem:[#allocation5 + $0x1e0] sm:$0xff]  ;;  %v346_v29 = vpack.c.bf16 %v105_v23, %v101_v22  ;;  %v104_v31 = vld [vmem:[#allocation5 + $0x1f0] sm:$0xff]  ;;  %v41_v35 = vld [vmem:[#allocation2 + $0x8] sm:$0xff] }
  0x3d   :  { %337 = vmatpush1.bf16.msra.mxu1 %v336_v1  ;;  %307 = vmatprep.subr.bf16.mxu0 %v306_v2  ;;  %v316_v32 = vpack.c.bf16 %v102_v28, %v98_v27  ;;  %v348_v33 = vpack.c.bf16 %v104_v31, %v100_v30  ;;  %v40_v34 = vld [vmem:[#allocation2] sm:$0xff] }
  0x3e   :  { %339 = vmatprep.subr.bf16.mxu1 %v338_v6 }
  0x40   :  { %309 = vmatpush1.bf16.msra.mxu0 %v308_v12 }
  0x41   :  { %341 = vmatpush1.bf16.msra.mxu1 %v340_v13  ;;  %311 = vmatprep.subr.bf16.mxu0 %v310_v14 }
  0x42   :  { %343 = vmatprep.subr.bf16.mxu1 %v342_v18 }
  0x44   :  { %313 = vmatpush1.bf16.msra.mxu0 %v312_v24 }
  0x45   :  { %345 = vmatpush1.bf16.msra.mxu1 %v344_v25  ;;  %315 = vmatprep.subr.bf16.mxu0 %v314_v26 }
  0x46   :  { %347 = vmatprep.subr.bf16.mxu1 %v346_v29 }
  0x48   :  { %317 = vmatpush1.bf16.msra.mxu0 %v316_v32 }
  0x49   :  { %349 = vmatpush1.bf16.msra.mxu1 %v348_v33 }
  0x4b   :  { %171 = vmatmul.mubr.f32.vlgmr.msra.gmra.mrb[0].mxu0 %v40_v34 }
  0x4c   :  { %248 = vmatmul.mubr.f32.vlgmr.msra.gmra.mrb[0].mxu1 %v40_v34  ;;  %176 = vmatprep.mubr.f32.mxu0 %v436_v0 }
  0x4d   :  { %253 = vmatprep.mubr.f32.mxu1 %v436_v0 }
  0x4f   :  { %177 = vmatmul.mubr.f32.gmra.mrb[2].mxu0 %v41_v35 }
  0x50   :  { %254 = vmatmul.mubr.f32.gmra.mrb[2].mxu1 %v41_v35 }
 0x11e   :  { %v172_v36 = vpop.f32.mrb[0].mxu0 }
 0x11f   :  { %260 = vst [vmem:[#allocation7] sm:$0xff] %v172_v36  ;;  %v249_v37 = vpop.f32.mrb[0].mxu1  ;;  %v174_v38 = vpop.f32.mrb[1].mxu0 }
 0x120   :  { %262 = vst [vmem:[#allocation7 + $0x10] sm:$0xff] %v249_v37  ;;  %261 = vst [vmem:[#allocation7 + $0x8] sm:$0xff] %v174_v38  ;;  %v251_v39 = vpop.f32.mrb[1].mxu1 }
 0x121   :  { %263 = vst [vmem:[#allocation7 + $0x18] sm:$0xff] %v251_v39 }
 0x122   :  { %v178_v40 = vpop.f32.mrb[2].mxu0 }
 0x123   :  { %264 = vst [vmem:[#allocation7 + $0x20] sm:$0xff] %v178_v40  ;;  %v255_v41 = vpop.f32.mrb[2].mxu1  ;;  %v180_v42 = vpop.f32.mrb[3].mxu0 }
 0x124   :  { %266 = vst [vmem:[#allocation7 + $0x30] sm:$0xff] %v255_v41  ;;  %265 = vst [vmem:[#allocation7 + $0x28] sm:$0xff] %v180_v42  ;;  %v257_v0 = vpop.f32.mrb[3].mxu1 }
 0x125   :  { %267 = vst [vmem:[#allocation7 + $0x38] sm:$0xff] %v257_v0 }
 0x126   :  { %413 = shalt.err (!%p410_p6)
}
 0x127   :  { %s414_s12 = scalar_lea.hbm %s501_s2, 1024 }
 0x128   :  { %p415_p7 = scmp.ne.s32.totalorder %s501_s2, %s414_s12  ;;  %p418_p8 = scmp.lt.u32.totalorder %s414_s12, %s501_s2 }
 0x12a   :  { %p420_p9 = pnand %p418_p8, %p415_p7 }
 0x12c   :  { %423 = shalt.err (!%p420_p9)
}
 0x12d   :  { %279 = dma.vmem_to_hbm [thread:$0]  %s274_s8, 1024, %s501_s2, [#allocation4], %s434_s0, %s434_s0, %s435_s5  }
 0x12e   :  { %428 = dma.done.wait [#allocation4], 1024  }
 0x12f   :  { %429 = vsyncadd [#allocation4], 4294966272 }
 0x130   :  { %283 = vsyncpa [#allocation3], 1 }
 0x131   :  { %284 = vsyncpa [#allocation6], 1 }
 0x132   :  { %285 = vsyncpa [#allocation4], 1 }

</bundles_post_ra>
